<compile_context>
chip_gen: v6e
topology: v6e:2x2x1
jax: 0.10.0
libtpu: 0.0.40
codegen_flags: <defaults>
</compile_context>

<pallas_src>
import functools
import math

import jax
import jax.numpy as jnp
from jax.experimental import pallas as pl
from jax.experimental.pallas import tpu as pltpu


def _nerf_posenc_kernel(x_ref, o_ref, *, in_dim: int, num_bands: int):
    # x_ref: (tn, in_dim)
    # o_ref: (tn, in_dim * 2 * num_bands)   -- flattened (i j), channel-major
    F = num_bands
    x = x_ref[...].astype(jnp.float32)                         # (tn, in_dim)

    # pi * 2**j row, j = 0..F-1, built in-kernel with the exponent-bit trick:
    # exact 2**j (no transcendental, no int overflow), then exact power-of-two
    # scaling of pi  ->  phase is bit-identical to the reference's (x*2^j)*pi.
    j = jax.lax.broadcasted_iota(jnp.int32, (1, F), 1)          # (1, F)
    pow2 = pltpu.bitcast((j + 127) << 23, jnp.float32)          # == 2.0 ** j exactly
    freq = jnp.float32(math.pi) * pow2                          # (1, F)

    # One (tn, in_dim*F) phase slab, channel-major: [c0(F) | c1(F) | ...].
    phase = jnp.concatenate(
        [x[:, c:c + 1] * freq for c in range(in_dim)], axis=-1)  # (tn, in_dim*F)

    # Single sin + single cos over the whole slab (EUP-slot fix).
    sin_all = jnp.sin(phase)
    cos_all = jnp.cos(phase)

    # Interleave back to the reference order [sin_c(F), cos_c(F)] per channel.
    pieces = []
    for c in range(in_dim):                                     # in_dim is tiny (e.g. 3)
        pieces.append(sin_all[:, c * F:(c + 1) * F])
        pieces.append(cos_all[:, c * F:(c + 1) * F])
    out = jnp.concatenate(pieces, axis=-1)                      # (tn, in_dim*2F)
    o_ref[...] = out.astype(o_ref.dtype)


def nerf_positional_encoding(x, num_frequency_bands: int = 10, tile_n: int = 8192):
    """Pallas implementation of NeRFPositionalEncoding.forward.

    x: (..., in_dim) float array.
    returns: (..., in_dim * 2 * num_frequency_bands)
    """
    in_dim = x.shape[-1]
    lead = x.shape[:-1]
    F = num_frequency_bands
    out_w = in_dim * 2 * F

    n_rows = int(math.prod(lead)) if lead else 1
    x2d = x.reshape(n_rows, in_dim)

    if n_rows <= 8:
        tn = n_rows                      # single tiny block; full-extent dims always legal
    else:
        # >= 2 grid steps (v7x megacore shards the "parallel" axis over 2 TCs),
        # sublane(8)-aligned, capped at tile_n. Ragged last block is masked.
        half = -(-n_rows // 2)
        tn = min(tile_n, ((half + 7) // 8) * 8)

    grid = (pl.cdiv(n_rows, tn),)

    kernel = functools.partial(_nerf_posenc_kernel, in_dim=in_dim, num_bands=F)

    out2d = pl.pallas_call(
        kernel,
        out_shape=jax.ShapeDtypeStruct((n_rows, out_w), x.dtype),
        grid_spec=pltpu.PrefetchScalarGridSpec(
            num_scalar_prefetch=0,
            grid=grid,
            in_specs=[pl.BlockSpec((tn, in_dim), lambda i: (i, 0))],
            out_specs=pl.BlockSpec((tn, out_w), lambda i: (i, 0)),
        ),
        compiler_params=pltpu.CompilerParams(
            dimension_semantics=("parallel",),
            # Room for 8192-row blocks incl. lane-padded input/output buffers
            # and compute temporaries; < 64 MiB v7x physical VMEM.
            vmem_limit_bytes=48 * 1024 * 1024,
        ),
    )(x2d)

    return out2d.reshape(*lead, out_w)


def _reference(x, num_frequency_bands: int = 10):
    # Mirrors the PyTorch op order: (x * 2**j) then * pi, sin/cos, flatten (i j).
    F = num_frequency_bands
    freqs = (2.0 ** jnp.arange(F, dtype=jnp.float32))[None, :]
    phase = (x[..., None] * freqs) * jnp.float32(math.pi)       # (..., in_dim, F)
    out = jnp.concatenate([jnp.sin(phase), jnp.cos(phase)], axis=-1)
    return out.reshape(*x.shape[:-1], x.shape[-1] * 2 * F).astype(x.dtype)


if __name__ == "__main__":
    key = jax.random.PRNGKey(0)
    # Small shapes consistent with the module: batch=2, seq=8, in_dim=3 coords.
    x = jax.random.uniform(key, (2, 8, 3), dtype=jnp.float32, minval=-1.0, maxval=1.0)

    num_frequency_bands = 10
    y = nerf_positional_encoding(x, num_frequency_bands=num_frequency_bands)
    y = jax.block_until_ready(y)

    y_ref = _reference(x, num_frequency_bands=num_frequency_bands)
    assert y.shape == (2, 8, 3 * 2 * num_frequency_bands), y.shape
    # Phases reach |pi * 2^9| ~ 1.6e3; XLA's and Mosaic's f32 sin/cos may use
    # slightly different range reductions, so allow some headroom in the check.
    assert jnp.allclose(y, y_ref, atol=1e-3, rtol=1e-3), \
        f"mismatch vs reference: {float(jnp.max(jnp.abs(y - y_ref)))}"

    print("KERNEL_OK")
</pallas_src>

<mosaic_0001>
module attributes {stable_mosaic.version = 11 : i64} {
  func.func @_nerf_posenc_kernel(%arg0: i32, %arg1: memref<8x3xf32, #tpu.memory_space<vmem>>, %arg2: memref<8x60xf32, #tpu.memory_space<vmem>>) attributes {dimension_semantics = [#tpu.dimension_semantics<parallel>], iteration_bounds = array<i64: 2>, scalar_prefetch = 0 : i64, scratch_operands = 0 : i64, tpu.core_type = #tpu.core_type<tc>, window_params = [{transform_indices = @transform_0, window_bounds = array<i64: 8, 3>}, {transform_indices = @transform_1, window_bounds = array<i64: 8, 60>}]} {
    %c0 = arith.constant 0 : index
    %c0_0 = arith.constant 0 : index
    %0 = vector.load %arg1[%c0, %c0_0] : memref<8x3xf32, #tpu.memory_space<vmem>>, vector<8x3xf32>
    %1 = tpu.iota {dimensions = array<i32: 1>} : vector<1x10xi32>
    %c127_i32 = arith.constant 127 : i32
    %2 = vector.broadcast %c127_i32 : i32 to vector<1x10xi32>
    %3 = arith.addi %1, %2 : vector<1x10xi32>
    %c23_i32 = arith.constant 23 : i32
    %4 = vector.broadcast %c23_i32 : i32 to vector<1x10xi32>
    %5 = arith.shli %3, %4 : vector<1x10xi32>
    %6 = tpu.bitcast %5 : vector<1x10xi32> -> vector<1x10xf32>
    %cst = arith.constant 3.14159274 : f32
    %7 = vector.broadcast %cst : f32 to vector<1x10xf32>
    %8 = arith.mulf %7, %6 : vector<1x10xf32>
    %9 = vector.extract_strided_slice %0 {offsets = [0, 0], sizes = [8, 1], strides = [1, 1]} : vector<8x3xf32> to vector<8x1xf32>
    %10 = vector.broadcast %9 : vector<8x1xf32> to vector<8x10xf32>
    %11 = vector.broadcast %8 : vector<1x10xf32> to vector<8x10xf32>
    %12 = arith.mulf %10, %11 : vector<8x10xf32>
    %13 = vector.extract_strided_slice %0 {offsets = [0, 1], sizes = [8, 1], strides = [1, 1]} : vector<8x3xf32> to vector<8x1xf32>
    %14 = vector.broadcast %13 : vector<8x1xf32> to vector<8x10xf32>
    %15 = vector.broadcast %8 : vector<1x10xf32> to vector<8x10xf32>
    %16 = arith.mulf %14, %15 : vector<8x10xf32>
    %17 = vector.extract_strided_slice %0 {offsets = [0, 2], sizes = [8, 1], strides = [1, 1]} : vector<8x3xf32> to vector<8x1xf32>
    %18 = vector.broadcast %17 : vector<8x1xf32> to vector<8x10xf32>
    %19 = vector.broadcast %8 : vector<1x10xf32> to vector<8x10xf32>
    %20 = arith.mulf %18, %19 : vector<8x10xf32>
    %21 = tpu.concatenate %12, %16, %20 in 1 : vector<8x10xf32>, vector<8x10xf32>, vector<8x10xf32> -> vector<8x30xf32>
    %22 = math.sin %21 : vector<8x30xf32>
    %23 = math.cos %21 : vector<8x30xf32>
    %24 = vector.extract_strided_slice %22 {offsets = [0, 0], sizes = [8, 10], strides = [1, 1]} : vector<8x30xf32> to vector<8x10xf32>
    %25 = vector.extract_strided_slice %23 {offsets = [0, 0], sizes = [8, 10], strides = [1, 1]} : vector<8x30xf32> to vector<8x10xf32>
    %26 = vector.extract_strided_slice %22 {offsets = [0, 10], sizes = [8, 10], strides = [1, 1]} : vector<8x30xf32> to vector<8x10xf32>
    %27 = vector.extract_strided_slice %23 {offsets = [0, 10], sizes = [8, 10], strides = [1, 1]} : vector<8x30xf32> to vector<8x10xf32>
    %28 = vector.extract_strided_slice %22 {offsets = [0, 20], sizes = [8, 10], strides = [1, 1]} : vector<8x30xf32> to vector<8x10xf32>
    %29 = vector.extract_strided_slice %23 {offsets = [0, 20], sizes = [8, 10], strides = [1, 1]} : vector<8x30xf32> to vector<8x10xf32>
    %30 = tpu.concatenate %24, %25, %26, %27, %28, %29 in 1 : vector<8x10xf32>, vector<8x10xf32>, vector<8x10xf32>, vector<8x10xf32>, vector<8x10xf32>, vector<8x10xf32> -> vector<8x60xf32>
    %c0_1 = arith.constant 0 : index
    %c0_2 = arith.constant 0 : index
    %31 = vector.load %arg2[%c0_1, %c0_2] : memref<8x60xf32, #tpu.memory_space<vmem>>, vector<8x60xf32>
    tpu.vector_store %arg2[%c0_1, %c0_2], %30 {strides = array<i32>} : memref<8x60xf32, #tpu.memory_space<vmem>>, vector<8x60xf32>,
    return
  }
  func.func @transform_0(%arg0: i32) -> (i32, i32) {
    %c0_i32 = arith.constant 0 : i32
    %c0_i32_0 = arith.constant 0 : i32
    return %arg0, %c0_i32 : i32, i32
  }
  func.func @transform_1(%arg0: i32) -> (i32, i32) {
    %c0_i32 = arith.constant 0 : i32
    %c0_i32_0 = arith.constant 0 : i32
    return %arg0, %c0_i32 : i32, i32
  }
}

</mosaic_0001>

<bundles_post_ra>
// kernel: tpu_custom_call.1
= control target key start
LH: loop header
LB: loop body
LE: loop exit
PB: predicated region body
PF: predicated region fallthrough
CT: control target
= control target key end

     0   :  { %6 = vsyncpa [#allocation3], 0  ;;  %s743_s0 = inlined_call_operand.vmem [shape: f32[16,3], index: 0, kind: input, shape index: {}]   ;;  %s744_s1 = inlined_call_operand.hbm [shape: f32[16,60], index: 1, kind: output, shape index: {}]  }
   0x1   :  { %8 = vsyncpa [#allocation3 + $0x1], 0  ;;  %s619_s6 = smov 0   ;;  %s621_s7 = smov 0  }
   0x2   :  { %s623_s8 = smov 0   ;;  %s625_s9 = smov 0  }
   0x3 LB: > { %s640_s10 = sadd.s32 4294967295, %s594_s9   ;;  %s454_s11 = sadd.s32 4294967294, %s594_s9   ;;  %s594_s9 = sphi %s625_s9, %s750_s9   ;;  %s590_s8 = sphi %s623_s8, %s749_s8   ;;  %s586_s7 = sphi %s621_s7, %s748_s7   ;;  %s582_s6 = sphi %s619_s6, %s747_s6  }
   0x4   : > { %s644_s12 = sadd.s32 1, %s594_s9   ;;  %s47_s13 = sadd.s32 1, %s590_s8 }
   0x5   : > { %s44_s14 = ssub.s32 %s594_s9, %s644_s12  ;;  %p57_p0 = scmp.ne.s32.totalorder %s590_s8, %s586_s7 }
   0x6   : > { %p45_p1 = scmp.eq.s32.totalorder %s44_s14, 0  ;;  %p58_p2 = scmp.eq.s32.totalorder %s640_s10, 1 }
   0x7   : > { %p63_p3 = scmp.ne.s32.totalorder %s586_s7, %s582_s6  ;;  %p64_p4 = scmp.eq.s32.totalorder %s454_s11, 1 }
   0x8   : > { %s655_s15 = scalar_select %p45_p1, %s590_s8, %s47_s13  }
   0x9   : > { %p657_p5 = por %p58_p2, %p57_p0  ;;  %p661_p6 = por %p64_p4, %p63_p3 }
   0xa   : > { %p457_p7 = scmp.ge.s32.totalorder %s594_s9, 1  ;;  %p89_p8 = scmp.lt.s32.totalorder %s594_s9, 3 }
   0xc   : > { %p90_p9 = pnand %p457_p7, %p89_p8 }
   0xd   : > { %p108_p10 = scmp.lt.s32.totalorder (!%p90_p9), %s640_s10, 1  ;;  %s599_s23 = smov (!%p90_p9), 10  }
   0xe   : > { %93 = sbr.rel (%p90_p9) target bundleno = 490 (0x1ea), region = 24  ;;  %s600_s24 = smov (!%p90_p9), 20  }
   0xf   : > { %s607_s25 = smov (!%p90_p9), 30   ;;  %s105_s26 = sand.u32 (!%p90_p9), 1, %s586_s7  }
  0x10   : > { %s458_s27 = sshll.u32 (!%p90_p9), %s105_s26, 3  ;;  %s469_s28 = sshll.u32 (!%p90_p9), %s640_s10, 7 }
  0x11   : > { %s107_s29 = scalar_lea.vmem (!%p90_p9), [#allocation2], %s458_s27  ;;  %s708_s4 = scalar_lea.hbm (!%p90_p9), %s744_s1, %s469_s28 }
  0x12   : > { %s395_s30 = sshll.u32 (!%p90_p9), %s107_s29, 4  ;;  %s382_s5 = scalar_lea.sflag (!%p90_p9), [#allocation3], %s105_s26  ;;  %s396_s30 = int_to_ptr.vmem [resolvable:$true] %s395_s30 }
  0x13   : > { %v596_v0 = vmov 1   ;;  %v597_v1 = vmov 0   ;;  %s109_s18 = scalar_select %p108_p10, %s640_s10, 1  ;;  %v598_v3 = vmov 2   ;;  %v113_v4 = vlaneseq }
  0x14   : > { %527 = vset.pattern.permute.xlu0 %v596_v0  ;;  %529 = vset.pattern.permute.xlu1 %v597_v1  ;;  %vm143_vm0 = vcmask 80896   ;;  %vm145_vm1 = vcmask 162816   ;;  %v601_v29 = vmov 683565275   ;;  %v602_v31 = vmov 2475754826  }
  0x15   : > { %s459_s19 = sshll.u32 %s109_s18, 3  ;;  %v114_v5 = vand.u32 127, %v113_v4  ;;  %v603_v34 = vmov 2131351028   ;;  %v604_v37 = vmov 2102212464  }
  0x16   : > { %s111_s22 = scalar_lea.vmem %s743_s0, %s459_s19  ;;  %v605_v40 = vmov 920167782   ;;  %v606_v43 = vmov 1326507024   ;;  %s534_s11 = scalar_lea.vmem %s396_s30, 128 }
  0x17   : > { %v112_v2 = vld [vmem:[%s111_s22] sm:$0xff]  ;;  %v115_v6 = vadd.s32 127, %v114_v5  ;;  %p535_p11 = scmp.ne.s32.totalorder %s396_s30, %s534_s11  ;;  %s608_s10 = smov [#allocation2]  }
  0x18   : > { %126 = vperm.xlu0 %527, %v112_v2   ;;  %121 = vperm.xlu1 %529, %v112_v2   ;;  %s538_s13 = sshll.u32 %s608_s10, 4  ;;  %s539_s13 = int_to_ptr.vmem [resolvable:$false] %s538_s13 }
  0x19   : > { %v116_v7 = vshll.u32 %v115_v6, 23  ;;  %p536_p12 = pnand %p535_p11, %p657_p5  ;;  %s540_s14 = scalar_lea.vmem %s539_s13, 256 }
  0x1a   : > { %p541_p0 = scmp.lt.s32.totalorder %s396_s30, %s539_s13  ;;  %p542_p1 = scmp.lt.s32.totalorder %s540_s14, %s534_s11 }
  0x1b   : > { %v118_v8 = vmul.f32 3.1415927, %v116_v7  ;;  %p537_p13 = pneg %p536_p12 }
  0x1c   : > { %528 = vset.pattern.permute.xlu0 %v598_v3  ;;  %p543_p2 = por %p542_p1, %p541_p0 }
  0x1d   : > { %131 = vperm.xlu0 %528, %v112_v2  }
  0x1e   : > { %p544_p3 = pnand %p543_p2, %p537_p13 }
  0x93   : > { %v127_v9 = vpop.permute.xlu0 %126  ;;  %v122_v13 = vpop.permute.xlu1 %121 }
  0x94   : > { %v129_v10 = vmul.f32 %v127_v9, %v118_v8  ;;  %v124_v15 = vmul.f32 %v122_v13, %v118_v8 }
  0x96   : > { %136 = vrot.lane.b32.xlu1 %v129_v10, %s599_s23 }
  0x98   : > { %v132_v11 = vpop.permute.xlu0 %131 }
  0x99   : > { %v134_v12 = vmul.f32 %v132_v11, %v118_v8 }
  0x9b   : > { %140 = vrot.lane.b32.xlu1 %v134_v12, %s600_s24 }
 0x108   : > { %v137_v14 = vpop.permute.xlu1 %136 }
 0x109   : > { %v144_v16 = vsel %vm143_vm0, %v124_v15, %v137_v14 }
 0x10d   : > { %v141_v17 = vpop.permute.xlu1 %140 }
 0x10e   : > { %v676_v18 = vsel %vm145_vm1, %v144_v16, %v141_v17 }
 0x10f   : > { %v150_v19 = vand.u32 2139095040, %v676_v18  ;;  %v147_v23 = vand.u32 2147483647, %v676_v18  ;;  %vm149_vm9 = vcmp.lt.s32.totalorder %v676_v18, 0 }
 0x111   : > { %v151_v20 = vshrl.u32 %v150_v19, 23  ;;  %v154_v26 = vand.u32 8388607, %v147_v23  ;;  %vm148_vm10 = vcmp.le.f32.partialorder %v147_v23, 0.7853982 }
 0x113   : > { %v460_v21 = vadd.s32 4294967169, %v151_v20  ;;  %v155_v45 = vor.u32 8388608, %v154_v26 }
 0x115   : > { %v157_v22 = vadd.s32 1, %v460_v21  ;;  %v195_v59 = vshll.u32 %v155_v45, 8 }
 0x117   : > { %vm158_vm2 = vcmp.gt.s32.totalorder %v157_v22, 0 }
 0x118   : > { %v159_v24 = vsel %vm158_vm2, %v157_v22, 0 }
 0x119   : > { %v161_v25 = vand.u32 31, %v159_v24  ;;  %v160_v28 = vshrl.u32 %v159_v24, 5 }
 0x11b   : > { %v162_v27 = vsub.s32 32, %v161_v25  ;;  %v164_v30 = vshll.u32 %v601_v29, %v161_v25  ;;  %v167_v32 = vshll.u32 %v602_v31, %v161_v25  ;;  %v170_v36 = vshll.u32 %v603_v34, %v161_v25 }
 0x11c   : > { %v173_v39 = vshll.u32 %v604_v37, %v161_v25  ;;  %v176_v42 = vshll.u32 %v605_v40, %v161_v25  ;;  %vm179_vm3 = vcmp.lt.s32.totalorder %v160_v28, 1  ;;  %vm182_vm4 = vcmp.lt.s32.totalorder %v160_v28, 4 }
 0x11d   : > { %v165_v33 = vshrl.u32 %v602_v31, %v162_v27  ;;  %v168_v35 = vshrl.u32 %v603_v34, %v162_v27  ;;  %v171_v38 = vshrl.u32 %v604_v37, %v162_v27  ;;  %v174_v41 = vshrl.u32 %v605_v40, %v162_v27 }
 0x11e   : > { %v177_v44 = vshrl.u32 %v606_v43, %v162_v27  ;;  %v163_v54 = vshrl.u32 %v601_v29, %v162_v27  ;;  %vm181_vm5 = vcmp.lt.s32.totalorder %v160_v28, 3  ;;  %vm180_vm6 = vcmp.lt.s32.totalorder %v160_v28, 2 }
 0x11f   : > { %v166_v46 = vor.u32 %v165_v33, %v164_v30  ;;  %v169_v47 = vor.u32 %v168_v35, %v167_v32  ;;  %v172_v48 = vor.u32 %v171_v38, %v170_v36  ;;  %v175_v49 = vor.u32 %v174_v41, %v173_v39 }
 0x120   : > { %v178_v50 = vor.u32 %v177_v44, %v176_v42 }
 0x121   : > { %v184_v51 = vsel %vm182_vm4, %v172_v48, 2102212464  ;;  %v187_v52 = vsel %vm179_vm3, %v166_v46, %v169_v47  ;;  %v191_v53 = vsel %vm179_vm3, %v169_v47, %v172_v48  ;;  %v188_v55 = vsel %vm182_vm4, %v175_v49, 920167782 }
 0x122   : > { %v192_v56 = vsel %vm182_vm4, %v178_v50, 1326507024  ;;  %v189_v57 = vsel %vm181_vm5, %v172_v48, %v188_v55  ;;  %v183_v60 = vsel %vm179_vm3, %v163_v54, %v166_v46  ;;  %v185_v61 = vsel %vm181_vm5, %v169_v47, %v184_v51 }
 0x123   : > { %v193_v58 = vsel %vm181_vm5, %v175_v49, %v192_v56  ;;  %v190_v62 = vsel %vm180_vm6, %v187_v52, %v189_v57  ;;  %v186_v4 = vsel %vm180_vm6, %v183_v60, %v185_v61  ;;  %vm239_vm3 = vweird.f32 %v676_v18 }
 0x124   : > { %v194_v63 = vsel %vm180_vm6, %v191_v53, %v193_v58  ;;  %v685_v2 = vmul.u32.u64.low %v195_v59, %v190_v62  ;;  %v686_v3 = vmul.u32.u64.high %v195_v59, %v190_v62, %v685_v2  ;;  %v202_v6 = vmul.u32 %v195_v59, %v186_v4 }
 0x125   : > { %v682_v0 = vmul.u32.u64.low %v195_v59, %v194_v63  ;;  %v683_v1 = vmul.u32.u64.high %v195_v59, %v194_v63, %v682_v0  ;;  %vm373_vm4 = vcmask 244736   ;;  %vm375_vm5 = vcmask 326656  }
 0x126   : > { %v205_v5 = vadd.s32 1, %v686_v3  ;;  %vm377_vm6 = vcmask 408576  }
 0x127   : > { %vm204_vm7 = vc.u32 %v683_v1, %v685_v2  ;;  %v203_v19 = vadd.s32 %v685_v2, %v683_v1 }
 0x128   : > { %v206_v7 = vsel %vm204_vm7, %v205_v5, %v686_v3  ;;  %vm379_vm7 = vcmask 490496  }
 0x129   : > { %v207_v8 = vadd.s32 %v206_v7, %v202_v6 }
 0x12b   : > { %v208_v9 = vadd.s32 536870912, %v207_v8 }
 0x12d   : > { %v209_v10 = vshrl.u32 %v208_v9, 30 }
 0x12f   : > { %v210_v11 = vshll.u32 %v209_v10, 30  ;;  %v233_v33 = vsub.s32 4, %v209_v10 }
 0x131   : > { %v211_v12 = vsub.s32 %v207_v8, %v210_v11  ;;  %v234_v36 = vsel %vm149_vm9, %v233_v33, %v209_v10 }
 0x132   : > { %v236_v37 = vsel %vm148_vm10, 0, %v234_v36 }
 0x133   : > { %v213_v13 = vsub.s32 0, %v211_v12  ;;  %v240_v38 = vadd.s32 3, %v236_v37  ;;  %v344_v39 = vand.u32 3, %v236_v37 }
 0x135   : > { %v461_v14 = vmin.u32 %v213_v13, %v211_v12  ;;  %v241_v40 = vand.u32 3, %v240_v38  ;;  %vm349_vm11 = vcmp.eq.s32.totalorder %v344_v39, 2  ;;  %vm346_vm13 = vcmp.eq.s32.totalorder %v344_v39, 0 }
 0x136   : > { %vm345_vm15 = vcmp.lt.s32.totalorder %v344_v39, 2 }
 0x137   : > { %v215_v15 = vclz %v461_v14  ;;  %vm246_vm12 = vcmp.eq.s32.totalorder %v241_v40, 2  ;;  %vm243_vm14 = vcmp.eq.s32.totalorder %v241_v40, 0  ;;  %vm242_vm2 = vcmp.lt.s32.totalorder %v241_v40, 2 }
 0x139   : > { %v462_v16 = vadd.s32 4294967294, %v215_v15 }
 0x13b   : > { %vm463_vm8 = vcmp.lt.s32.totalorder %v462_v16, 0 }
 0x13c   : > { %v218_v17 = vsel %vm463_vm8, 0, %v462_v16 }
 0x13d   : > { %v219_v20 = vsub.s32 32, %v218_v17  ;;  %v223_v21 = vsub.s32 4294967266, %v218_v17  ;;  %v220_v22 = vshll.u32 %v211_v12, %v218_v17 }
 0x13f   : > { %v221_v24 = vshrl.u32 %v203_v19, %v219_v20  ;;  %v224_v25 = vadd.s32 127, %v223_v21 }
 0x141   : > { %v222_v26 = vor.u32 %v221_v24, %v220_v22  ;;  %v225_v27 = vshll.u32 %v224_v25, 23 }
 0x143   : > { %v226_v28 = vor.u32 4788187, %v225_v27  ;;  %v229_v30 = vcvt.s32.f32 %v222_v26 }
 0x145   : > { %v227_v29 = vand.u32 2147483647, %v226_v28 }
 0x147   : > { %v230_v31 = vmul.f32 %v229_v30, %v227_v29 }
 0x149   : > { %v231_v32 = vxor.u32 2147483648, %v230_v31 }
 0x14b   : > { %v232_v34 = vsel %vm149_vm9, %v231_v32, %v230_v31 }
 0x14c   : > { %v235_v35 = vsel %vm148_vm10, %v676_v18, %v232_v34 }
 0x14d   : > { %530 = vcosq.f32 %v235_v35 }
 0x14e   : > { %532 = vsinq.f32 %v235_v35 }
 0x15a   : > { %v531_v41 = vpop.eup %530 }
 0x15b   : > { %v533_v42 = vpop.eup %532  ;;  %v247_v43 = vxor.u32 2147483648, %v531_v41 }
 0x15c   : > { %v244_v44 = vxor.u32 2147483648, %v533_v42 }
 0x15d   : > { %v351_v45 = vsel %vm349_vm11, %v247_v43, %v533_v42  ;;  %v248_v23 = vsel %vm246_vm12, %v247_v43, %v533_v42 }
 0x15e   : > { %v348_v46 = vsel %vm346_vm13, %v531_v41, %v244_v44  ;;  %v245_v47 = vsel %vm243_vm14, %v531_v41, %v244_v44 }
 0x15f   : > { %v352_v48 = vsel %vm345_vm15, %v348_v46, %v351_v45  ;;  %v249_v49 = vsel %vm242_vm2, %v245_v47, %v248_v23 }
 0x160   : > { %v353_v50 = vsel %vm239_vm3, nan, %v352_v48  ;;  %v250_v51 = vsel %vm239_vm3, nan, %v249_v49 }
 0x161   : > { %355 = vrot.lane.b32.xlu0 %v353_v50, %s599_s23  ;;  %359 = vrot.lane.b32.xlu1 %v250_v51, %s599_s23 }
 0x165   : > { %362 = vrot.lane.b32.xlu0 %v353_v50, %s600_s24  ;;  %365 = vrot.lane.b32.xlu1 %v250_v51, %s600_s24 }
 0x169   : > { %368 = vrot.lane.b32.xlu0 %v353_v50, %s607_s25 }
 0x1d3   : > { %v356_v52 = vpop.permute.xlu0 %355  ;;  %v360_v53 = vpop.permute.xlu1 %359 }
 0x1d4   : > { %v371_v18 = vsel %vm143_vm0, %v250_v51, %v356_v52 }
 0x1d5   : > { %v372_v54 = vsel %vm145_vm1, %v371_v18, %v360_v53 }
 0x1d7   : > { %v363_v55 = vpop.permute.xlu0 %362  ;;  %v366_v57 = vpop.permute.xlu1 %365 }
 0x1d8   : > { %v374_v56 = vsel %vm373_vm4, %v372_v54, %v363_v55 }
 0x1d9   : > { %v376_v58 = vsel %vm375_vm5, %v374_v56, %v366_v57 }
 0x1db   : > { %v369_v59 = vpop.permute.xlu0 %368 }
 0x1dc   : > { %v378_v60 = vsel %vm377_vm6, %v376_v58, %v369_v59 }
 0x1dd   : > { %380 = vst.msk [vmem:[%s107_s29] sm:$0xff] %vm379_vm7, %v378_v60 }
 0x1de   : > { %547 = shalt.err (!%p544_p3)
}
 0x1df   : > { %s548_s18 = scalar_lea.hbm %s708_s4, 128  ;;  %s552_s21 = scalar_lea.hbm %s744_s1, 256 }
 0x1e0   : > { %p549_p4 = scmp.ne.s32.totalorder %s708_s4, %s548_s18  ;;  %p553_p9 = scmp.lt.s32.totalorder %s708_s4, %s744_s1 }
 0x1e1   : > { %p554_p10 = scmp.lt.s32.totalorder %s552_s21, %s548_s18 }
 0x1e2   : > { %p550_p7 = pnand %p549_p4, %p657_p5 }
 0x1e3   : > { %p555_p11 = por %p554_p10, %p553_p9 }
 0x1e4   : > { %p551_p8 = pneg %p550_p7 }
 0x1e6   : > { %p556_p12 = pnand %p555_p11, %p551_p8 }
 0x1e8   : > { %559 = shalt.err (!%p556_p12)
}
 0x1e9   : > { %476 = dma.vmem_to_hbm [thread:$0]  (%p657_p5), %s396_s30, 128, %s708_s4, %s382_s5  }
 0x1ea PF: > { %p482_p13 = scmp.ge.s32.totalorder %s594_s9, 2  ;;  %s407_s24 = sand.u32 1, %s582_s6  }
 0x1eb   : > { %s408_s25 = scalar_lea.sflag [#allocation3], %s407_s24 }
 0x1ec   : > { %p479_p0 = pnand %p482_p13, %p661_p6 }
 0x1ee   : > { %p480_p1 = pneg %p479_p0 }
 0x1f0   : > { %577 = dma.done.wait (%p480_p1), %s408_s25, 128  }
 0x1f1   : > { %579 = vsyncadd (%p480_p1), %s408_s25, 4294967168  ;;  %p11_p2 = scmp.ge.s32.totalorder %s644_s12, 4   ;;  %s747_s6 = smov %s586_s7 }
 0x1f2   : > { %s748_s7 = smov %s590_s8  ;;  %s749_s8 = smov %s655_s15 }
 0x1f3   : > { %s750_s9 = smov %s644_s12  ;;  %13 = sbr.rel (!%p11_p2) target bundleno = 3 (0x3), region = 59 }
 0x1f8   :  { %413 = vsyncpa [#allocation3], 1 }
 0x1f9   :  { %415 = vsyncpa [#allocation3 + $0x1], 1 }

</bundles_post_ra>
